<compile_context>
chip_gen: v7x
topology: tpu7x:2x2x1
jax: 0.10.0
libtpu: 0.0.40
codegen_flags: <defaults>
</compile_context>

<pallas_src>
import numpy as np
import jax
import jax.numpy as jnp
from jax.experimental import pallas as pl
from jax.experimental.pallas import tpu as pltpu

NC = 16           # out_nc * nc_d[0]
CIN = 2 * NC      # conv1 input channels (out_nc * nc_d[0] * 2)


def _round_up(v, m):
    return ((v + m - 1) // m) * m


def _choose_strip_rows(H, N, Wp):
    """Output-strip height TH (divides H, multiple of 4 unless single strip)."""
    # per-lane f32 bytes of the big per-strip temporaries:
    #   xs (CIN) + t1 (9*NC) + h (NC) + t2 (9*NC) + out (NC)
    bytes_per_lane = 4 * (CIN + 2 * 9 * NC + 2 * NC)
    budget_rows = max(4, (12 * 1024 * 1024) // (Wp * bytes_per_lane) - 4)
    divs = [t for t in range(4, H + 1, 4) if H % t == 0 and t <= budget_rows]
    if not divs:
        return H                              # single whole-image strip
    for t in sorted(divs, reverse=True):      # biggest strip giving >=8 steps
        if N * (H // t) >= 8:
            return t
    return min(divs)                          # otherwise maximize step count


def _strip_masks(H, W, Wp, TH, n_strips):
    """Interior mask for the intermediate h over each strip's padded grid.

    h lives on a (TH+2, Wp) padded grid (flat, +1 lead / +1 tail lane); the
    mask zeroes everything that is conv2's zero padding (border ring, extra
    alignment columns, rows outside the image)."""
    Lh = (TH + 2) * Wp + 2
    m = np.arange(Lh, dtype=np.int64)
    q = m - 1                       # flat position in the strip's h grid
    b = q // Wp                     # strip-local padded row
    x_p = q - b * Wp                # padded column
    col_ok = (x_p >= 1) & (x_p <= W)
    masks = np.zeros((n_strips, 1, Lh), np.float32)
    for s in range(n_strips):
        row = s * TH - 1 + b        # global image row of this h position
        ok = col_ok & (row >= 0) & (row < H)
        masks[s, 0, :] = ok.astype(np.float32)
    return jnp.asarray(masks)


def udb_forward(x_nchw, w1, w2, strip_rows=None):
    """x_nchw: (N, 32, H, W) f32; w*: (3, 3, Cin, Cout) HWIO.
    Returns (N, 16, H, W) f32 (same layout as the PyTorch module)."""
    N, C, H, W = x_nchw.shape
    assert C == CIN
    Wp = _round_up(W + 2, 32)                     # padded width (lane friendly)
    TH = strip_rows if strip_rows is not None else _choose_strip_rows(H, N, Wp)
    assert H % TH == 0
    n_strips = H // TH
    assert n_strips == 1 or (TH * Wp) % 128 == 0  # output block stays 128-lane
    Hp2 = H + 4                                   # 2 zero rows top + bottom
    LEAD, TAIL = 2, 8                             # flat-axis margins
    Lflat = Hp2 * Wp + LEAD + TAIL
    Lx = (TH + 4) * Wp + 4                        # per-strip input lanes
    Lh = (TH + 2) * Wp + 2                        # per-strip h lanes
    Mo = TH * Wp                                  # per-strip output lanes

    # Zero-pad: rows by 2/2, cols by 1 left + (Wp-W-1) right; flatten (free
    # reshape) and add the small flat-axis margins so every tap slab is a
    # pure in-bounds lane shift inside the kernel.
    xp = jnp.pad(x_nchw, ((0, 0), (0, 0), (2, 2), (1, Wp - W - 1)))
    xflat = jnp.pad(xp.reshape(N, CIN, Hp2 * Wp), ((0, 0), (0, 0), (LEAD, TAIL)))

    # Tap-packed, channel-major weights: row index = (dy*3+dx)*NC + c_out.
    w1p = jnp.transpose(w1, (0, 1, 3, 2)).reshape(9 * NC, CIN)
    w2p = jnp.transpose(w2, (0, 1, 3, 2)).reshape(9 * NC, NC)
    masks = _strip_masks(H, W, Wp, TH, n_strips)

    def accumulate_taps(t, out_lanes):
        # t: (9*NC, L_src) tap matmul result. Sum the 9 taps: each is the
        # 16-row group of tap k shifted by the flat lane offset dy*Wp + dx.
        acc = None
        for dy in range(3):
            for dx in range(3):
                k = dy * 3 + dx
                off = dy * Wp + dx
                slab = t[k * NC:(k + 1) * NC, off:off + out_lanes]
                acc = slab if acc is None else acc + slab
        return acc                                # (NC, out_lanes)

    def kernel(x_ref, w1_ref, w2_ref, m_ref, o_ref):
        # x_ref : (1, CIN, Lflat)  whole padded image (channel-major, flat)
        # w1_ref: (9*NC, CIN)      tap-packed conv1 weights
        # w2_ref: (9*NC, NC)       tap-packed conv2 weights
        # m_ref : (1, 1, Lh)       border-ring mask for this strip
        # o_ref : (1, NC, Mo)      lane-dense output strip (NCHW order)
        s = pl.program_id(1)
        start = pl.multiple_of(s * Mo, Mo)        # 128-aligned lane offset
        xs = x_ref[0, :, pl.ds(start, Lx)]        # (CIN, Lx)

        # conv1: one MXU matmul + 9 dense shifted adds, ReLU, implicit re-pad
        # via the precomputed mask (no VMEM scratch, no zero pass).
        t1 = jnp.dot(w1_ref[...], xs, preferred_element_type=jnp.float32)
        h = jnp.maximum(accumulate_taps(t1, Lh), 0.0) * m_ref[0]   # (NC, Lh)

        # conv2 (no activation, no bias)
        t2 = jnp.dot(w2_ref[...], h, preferred_element_type=jnp.float32)
        o_ref[0] = accumulate_taps(t2, Mo)                          # (NC, Mo)

    flops = 2 * 9 * N * H * W * (CIN * NC + NC * NC)
    bytes_accessed = 4 * (N * CIN * Hp2 * Wp + N * NC * H * Wp
                          + 9 * NC * (CIN + NC))

    out = pl.pallas_call(
        kernel,
        out_shape=jax.ShapeDtypeStruct((N, NC, H * Wp), jnp.float32),
        grid_spec=pltpu.PrefetchScalarGridSpec(
            num_scalar_prefetch=0,
            grid=(N, n_strips),
            in_specs=[
                pl.BlockSpec((1, CIN, Lflat), lambda n, s: (n, 0, 0)),
                pl.BlockSpec((9 * NC, CIN), lambda n, s: (0, 0)),
                pl.BlockSpec((9 * NC, NC), lambda n, s: (0, 0)),
                pl.BlockSpec((1, 1, Lh), lambda n, s: (s, 0, 0)),
            ],
            out_specs=pl.BlockSpec((1, NC, Mo), lambda n, s: (n, 0, s)),
        ),
        compiler_params=pltpu.CompilerParams(
            dimension_semantics=("parallel", "arbitrary"),
            vmem_limit_bytes=48 * 1024 * 1024),
        cost_estimate=pl.CostEstimate(flops=flops, transcendentals=0,
                                      bytes_accessed=bytes_accessed),
    )(xflat, w1p, w2p, masks)

    # (N, NC, H*Wp) -> (N, NC, H, Wp) is a free reshape; drop the pad columns.
    out = out.reshape(N, NC, H, Wp)
    return out[:, :, :, 1:W + 1]


def init_params(key):
    """Deterministic bias-free init (PyTorch-default-style uniform), HWIO."""
    k1, k2 = jax.random.split(key)
    b1 = 1.0 / np.sqrt(CIN * 9.0)
    b2 = 1.0 / np.sqrt(NC * 9.0)
    w1 = jax.random.uniform(k1, (3, 3, CIN, NC), jnp.float32, -b1, b1)
    w2 = jax.random.uniform(k2, (3, 3, NC, NC), jnp.float32, -b2, b2)
    return w1, w2


def _reference_forward(x_nchw, w1, w2):
    """Pure-JAX reference using lax.conv, for correctness check."""
    def conv(x, w):
        w_oihw = jnp.transpose(w, (3, 2, 0, 1))
        return jax.lax.conv_general_dilated(
            x, w_oihw, window_strides=(1, 1), padding="SAME",
            dimension_numbers=("NCHW", "OIHW", "NCHW"))
    return conv(jax.nn.relu(conv(x_nchw, w1)), w2)


if __name__ == "__main__":
    key = jax.random.PRNGKey(0)
    pkey, xkey = jax.random.split(key)
    w1, w2 = init_params(pkey)

    N, H, W = 2, 16, 16
    x = jax.random.normal(xkey, (N, CIN, H, W), jnp.float32)

    out = jax.block_until_ready(udb_forward(x, w1, w2))
    ref = jax.block_until_ready(_reference_forward(x, w1, w2))

    assert out.shape == (N, NC, H, W)
    assert jnp.allclose(out, ref, atol=1e-4, rtol=1e-4), \
        float(jnp.max(jnp.abs(out - ref)))

    print("KERNEL_OK")
</pallas_src>

<mosaic_0001>
module attributes {stable_mosaic.version = 11 : i64} {
  func.func @kernel(%arg0: i32, %arg1: i32, %arg2: memref<1x32x650xf32, #tpu.memory_space<vmem>>, %arg3: memref<144x32xf32, #tpu.memory_space<vmem>>, %arg4: memref<144x16xf32, #tpu.memory_space<vmem>>, %arg5: memref<1x1x194xf32, #tpu.memory_space<vmem>>, %arg6: memref<1x16x128xf32, #tpu.memory_space<vmem>>) attributes {dimension_semantics = [#tpu.dimension_semantics<parallel>, #tpu.dimension_semantics<arbitrary>], iteration_bounds = array<i64: 2, 4>, scalar_prefetch = 0 : i64, scratch_operands = 0 : i64, tpu.core_type = #tpu.core_type<tc>, window_params = [{transform_indices = @transform_0, window_bounds = array<i64: 1, 32, 650>}, {pipeline_mode = #tpu.pipeline_mode<synchronous>, transform_indices = @transform_1, window_bounds = array<i64: 144, 32>}, {pipeline_mode = #tpu.pipeline_mode<synchronous>, transform_indices = @transform_2, window_bounds = array<i64: 144, 16>}, {transform_indices = @transform_3, window_bounds = array<i64: 1, 1, 194>}, {transform_indices = @transform_4, window_bounds = array<i64: 1, 16, 128>}]} {
    %c128_i32 = arith.constant 128 : i32
    %0 = arith.muli %arg1, %c128_i32 : i32
    %1 = tpu.assume_multiple %0, 128 : i32
    %c0 = arith.constant 0 : index
    %c0_0 = arith.constant 0 : index
    %2 = arith.index_cast %1 : i32 to index
    %3 = vector.load %arg2[%c0, %c0_0, %2] : memref<1x32x650xf32, #tpu.memory_space<vmem>>, vector<1x32x260xf32>
    %4 = vector.shape_cast %3 : vector<1x32x260xf32> to vector<32x260xf32>
    %c0_1 = arith.constant 0 : index
    %c0_2 = arith.constant 0 : index
    %5 = vector.load %arg3[%c0_1, %c0_2] : memref<144x32xf32, #tpu.memory_space<vmem>>, vector<144x32xf32>
    %cst = arith.constant dense<0.000000e+00> : vector<144x260xf32>
    %6 = tpu.matmul %5, %4, %cst {dimension_numbers = #tpu.dot_dimension_numbers<[1], [0], [0], [1], [0, 0, 1, 1], [], []>} : vector<144x32xf32>, vector<32x260xf32>, vector<144x260xf32> -> vector<144x260xf32>
    %7 = vector.extract_strided_slice %6 {offsets = [0, 0], sizes = [16, 194], strides = [1, 1]} : vector<144x260xf32> to vector<16x194xf32>
    %8 = vector.extract_strided_slice %6 {offsets = [16, 1], sizes = [16, 194], strides = [1, 1]} : vector<144x260xf32> to vector<16x194xf32>
    %9 = arith.addf %7, %8 : vector<16x194xf32>
    %10 = vector.extract_strided_slice %6 {offsets = [32, 2], sizes = [16, 194], strides = [1, 1]} : vector<144x260xf32> to vector<16x194xf32>
    %11 = arith.addf %9, %10 : vector<16x194xf32>
    %12 = vector.extract_strided_slice %6 {offsets = [48, 32], sizes = [16, 194], strides = [1, 1]} : vector<144x260xf32> to vector<16x194xf32>
    %13 = arith.addf %11, %12 : vector<16x194xf32>
    %14 = vector.extract_strided_slice %6 {offsets = [64, 33], sizes = [16, 194], strides = [1, 1]} : vector<144x260xf32> to vector<16x194xf32>
    %15 = arith.addf %13, %14 : vector<16x194xf32>
    %16 = vector.extract_strided_slice %6 {offsets = [80, 34], sizes = [16, 194], strides = [1, 1]} : vector<144x260xf32> to vector<16x194xf32>
    %17 = arith.addf %15, %16 : vector<16x194xf32>
    %18 = vector.extract_strided_slice %6 {offsets = [96, 64], sizes = [16, 194], strides = [1, 1]} : vector<144x260xf32> to vector<16x194xf32>
    %19 = arith.addf %17, %18 : vector<16x194xf32>
    %20 = vector.extract_strided_slice %6 {offsets = [112, 65], sizes = [16, 194], strides = [1, 1]} : vector<144x260xf32> to vector<16x194xf32>
    %21 = arith.addf %19, %20 : vector<16x194xf32>
    %22 = vector.extract_strided_slice %6 {offsets = [128, 66], sizes = [16, 194], strides = [1, 1]} : vector<144x260xf32> to vector<16x194xf32>
    %23 = arith.addf %21, %22 : vector<16x194xf32>
    %cst_3 = arith.constant 0.000000e+00 : f32
    %24 = vector.broadcast %cst_3 : f32 to vector<16x194xf32>
    %25 = arith.maximumf %23, %24 : vector<16x194xf32>
    %c0_4 = arith.constant 0 : index
    %c0_5 = arith.constant 0 : index
    %c0_6 = arith.constant 0 : index
    %26 = vector.load %arg5[%c0_4, %c0_5, %c0_6] : memref<1x1x194xf32, #tpu.memory_space<vmem>>, vector<1x1x194xf32>
    %27 = vector.shape_cast %26 : vector<1x1x194xf32> to vector<1x194xf32>
    %28 = vector.broadcast %27 : vector<1x194xf32> to vector<16x194xf32>
    %29 = arith.mulf %25, %28 : vector<16x194xf32>
    %c0_7 = arith.constant 0 : index
    %c0_8 = arith.constant 0 : index
    %30 = vector.load %arg4[%c0_7, %c0_8] : memref<144x16xf32, #tpu.memory_space<vmem>>, vector<144x16xf32>
    %cst_9 = arith.constant dense<0.000000e+00> : vector<144x194xf32>
    %31 = tpu.matmul %30, %29, %cst_9 {dimension_numbers = #tpu.dot_dimension_numbers<[1], [0], [0], [1], [0, 0, 1, 1], [], []>} : vector<144x16xf32>, vector<16x194xf32>, vector<144x194xf32> -> vector<144x194xf32>
    %32 = vector.extract_strided_slice %31 {offsets = [0, 0], sizes = [16, 128], strides = [1, 1]} : vector<144x194xf32> to vector<16x128xf32>
    %33 = vector.extract_strided_slice %31 {offsets = [16, 1], sizes = [16, 128], strides = [1, 1]} : vector<144x194xf32> to vector<16x128xf32>
    %34 = arith.addf %32, %33 : vector<16x128xf32>
    %35 = vector.extract_strided_slice %31 {offsets = [32, 2], sizes = [16, 128], strides = [1, 1]} : vector<144x194xf32> to vector<16x128xf32>
    %36 = arith.addf %34, %35 : vector<16x128xf32>
    %37 = vector.extract_strided_slice %31 {offsets = [48, 32], sizes = [16, 128], strides = [1, 1]} : vector<144x194xf32> to vector<16x128xf32>
    %38 = arith.addf %36, %37 : vector<16x128xf32>
    %39 = vector.extract_strided_slice %31 {offsets = [64, 33], sizes = [16, 128], strides = [1, 1]} : vector<144x194xf32> to vector<16x128xf32>
    %40 = arith.addf %38, %39 : vector<16x128xf32>
    %41 = vector.extract_strided_slice %31 {offsets = [80, 34], sizes = [16, 128], strides = [1, 1]} : vector<144x194xf32> to vector<16x128xf32>
    %42 = arith.addf %40, %41 : vector<16x128xf32>
    %43 = vector.extract_strided_slice %31 {offsets = [96, 64], sizes = [16, 128], strides = [1, 1]} : vector<144x194xf32> to vector<16x128xf32>
    %44 = arith.addf %42, %43 : vector<16x128xf32>
    %45 = vector.extract_strided_slice %31 {offsets = [112, 65], sizes = [16, 128], strides = [1, 1]} : vector<144x194xf32> to vector<16x128xf32>
    %46 = arith.addf %44, %45 : vector<16x128xf32>
    %47 = vector.extract_strided_slice %31 {offsets = [128, 66], sizes = [16, 128], strides = [1, 1]} : vector<144x194xf32> to vector<16x128xf32>
    %48 = arith.addf %46, %47 : vector<16x128xf32>
    %c0_10 = arith.constant 0 : index
    %c0_11 = arith.constant 0 : index
    %c0_12 = arith.constant 0 : index
    %49 = vector.load %arg6[%c0_10, %c0_11, %c0_12] : memref<1x16x128xf32, #tpu.memory_space<vmem>>, vector<1x16x128xf32>
    %50 = vector.shape_cast %49 : vector<1x16x128xf32> to vector<16x128xf32>
    %51 = vector.shape_cast %48 : vector<16x128xf32> to vector<1x16x128xf32>
    tpu.vector_store %arg6[%c0_10, %c0_11, %c0_12], %51 {strides = array<i32>} : memref<1x16x128xf32, #tpu.memory_space<vmem>>, vector<1x16x128xf32>,
    return
  }
  func.func @transform_0(%arg0: i32, %arg1: i32) -> (i32, i32, i32) {
    %c0_i32 = arith.constant 0 : i32
    %c0_i32_0 = arith.constant 0 : i32
    %c0_i32_1 = arith.constant 0 : i32
    return %arg0, %c0_i32, %c0_i32_0 : i32, i32, i32
  }
  func.func @transform_1(%arg0: i32, %arg1: i32) -> (i32, i32) {
    %c0_i32 = arith.constant 0 : i32
    %c0_i32_0 = arith.constant 0 : i32
    %c0_i32_1 = arith.constant 0 : i32
    return %c0_i32, %c0_i32_0 : i32, i32
  }
  func.func @transform_2(%arg0: i32, %arg1: i32) -> (i32, i32) {
    %c0_i32 = arith.constant 0 : i32
    %c0_i32_0 = arith.constant 0 : i32
    %c0_i32_1 = arith.constant 0 : i32
    return %c0_i32, %c0_i32_0 : i32, i32
  }
  func.func @transform_3(%arg0: i32, %arg1: i32) -> (i32, i32, i32) {
    %c0_i32 = arith.constant 0 : i32
    %c0_i32_0 = arith.constant 0 : i32
    %c0_i32_1 = arith.constant 0 : i32
    return %arg1, %c0_i32, %c0_i32_0 : i32, i32, i32
  }
  func.func @transform_4(%arg0: i32, %arg1: i32) -> (i32, i32, i32) {
    %c0_i32 = arith.constant 0 : i32
    %c0_i32_0 = arith.constant 0 : i32
    return %arg0, %c0_i32, %arg1 : i32, i32, i32
  }
}

</mosaic_0001>

<bundles_post_ra>
// kernel: tpu_custom_call.1
= control target key start
LH: loop header
LB: loop body
LE: loop exit
PB: predicated region body
PF: predicated region fallthrough
CT: control target
= control target key end

     0   :  { %9 = vsyncpa [#allocation3], 0  ;;  %s2433_s0 = inlined_call_operand.vmem [shape: f32[2,32,650], index: 0, kind: input, shape index: {}]   ;;  %s2434_s1 = inlined_call_operand.vmem [shape: f32[144,32], index: 1, kind: input, shape index: {}]   ;;  %s2435_s2 = inlined_call_operand.vmem [shape: f32[144,16], index: 2, kind: input, shape index: {}]   ;;  %s2436_s3 = inlined_call_operand.hbm [shape: f32[4,1,194], index: 3, kind: input, shape index: {}]   ;;  %s2437_s4 = inlined_call_operand.hbm [shape: f32[2,16,512], index: 4, kind: output, shape index: {}]  }
   0x1   :  { %11 = vsyncpa [#allocation3 + $0x1], 0 }
   0x2   :  { %12 = vsyncpa [#allocation4], 0 }
   0x3   :  { %14 = vsyncpa [#allocation4 + $0x1], 0  ;;  %s1849_s15 = smov 0   ;;  %s1851_s16 = smov 0  }
   0x4   :  { %s1853_s17 = smov 0   ;;  %s1855_s18 = smov 0  }
   0x5   :  { %s1857_s19 = smov 0   ;;  %s1859_s20 = smov 0  }
   0x6   :  { %s1861_s21 = smov 0   ;;  %s1863_s22 = smov 0  }
   0x7   :  { %s1865_s23 = smov 0   ;;  %s1867_s24 = smov 0  }
   0x8   :  { %s1869_s25 = smov 0  }
   0x9 LB: > { %s1387_s26 = sadd.s32 4294967295, %s1808_s25   ;;  %s1388_s27 = sadd.s32 4294967294, %s1808_s25   ;;  %s1808_s25 = sphi %s1869_s25, %s20_s25   ;;  %s1804_s24 = sphi %s1867_s24, %s2470_s24   ;;  %s1800_s23 = sphi %s1865_s23, %s2469_s23   ;;  %s1796_s22 = sphi %s1863_s22, %s2468_s22   ;;  %s1792_s21 = sphi %s1861_s21, %s2467_s21   ;;  %s1788_s20 = sphi %s1859_s20, %s2466_s20   ;;  %s1784_s19 = sphi %s1857_s19, %s2465_s19   ;;  %s1780_s18 = sphi %s1855_s18, %s2464_s18   ;;  %s1776_s17 = sphi %s1853_s17, %s2463_s17   ;;  %s1772_s16 = sphi %s1851_s16, %s2462_s16   ;;  %s1768_s15 = sphi %s1849_s15, %s2461_s15  }
   0xa   : > { %s29_s28 = sadd.s32 1, %s1800_s23  ;;  %s32_s29 = sadd.s32 1, %s1804_s24 }
   0xb   : > { %p30_p0 = scmp.ge.s32.totalorder %s29_s28, 4  ;;  %s107_s30 = sadd.s32 1, %s1788_s20 }
   0xc   : > { %p114_p1 = scmp.ne.s32.totalorder %s1788_s20, %s1784_s19  ;;  %p115_p2 = scmp.eq.s32.totalorder %s1808_s25, 0 }
   0xd   : > { %s2472_s28 = smov (%p30_p0, %s29_s28), 0  ;;  %s2474_s29 = smov (!%p30_p0, %s32_s29), %s1804_s24 }
   0xe   : > { %2445 = sst [smem:[#allocation8_spill]] %s2472_s28  ;;  %s104_s5 = ssub.s32 %s1800_s23, %s2472_s28 }
   0xf   : > { %p1915_p3 = por %p115_p2, %p114_p1  ;;  %p34_p4 = scmp.ge.s32.totalorder %s2474_s29, 2 }
  0x10   : > { %p105_p5 = scmp.eq.s32.totalorder %s104_s5, 0  ;;  %p120_p6 = scmp.ne.s32.totalorder %s1784_s19, %s1780_s18 }
  0x11   : > { %p121_p7 = scmp.eq.s32.totalorder %s1387_s26, 0  ;;  %s2476_s29 = smov (%p34_p4, %s2474_s29), 0 }
  0x12   : > { %2447 = sst [smem:[#allocation9_spill]] %s2476_s29  ;;  %s130_s9 = ssub.s32 %s1804_s24, %s2476_s29 }
  0x13   : > { %s1923_s7 = scalar_select %p105_p5, %s1788_s20, %s107_s30  }
  0x14   : > { %p1925_p8 = por %p121_p7, %p120_p6  ;;  %s132_s10 = sor.u32 %s130_s9, %s104_s5 }
  0x15   : > { %s135_s11 = sadd.s32 1, %s1776_s17  ;;  %p133_p9 = scmp.eq.s32.totalorder %s132_s10, 0 }
  0x16   : > { %p145_p10 = scmp.ne.s32.totalorder %s1776_s17, %s1772_s16  ;;  %p146_p11 = scmp.eq.s32.totalorder %s1387_s26, 7 }
  0x17   : > { %p151_p12 = scmp.ne.s32.totalorder %s1772_s16, %s1768_s15  ;;  %p152_p0 = scmp.eq.s32.totalorder %s1388_s27, 7 }
  0x18   : > { %s1937_s12 = scalar_select %p133_p9, %s1776_s17, %s135_s11  }
  0x19   : > { %p1939_p13 = por %p146_p11, %p145_p10  ;;  %p1554_p1 = scmp.lt.s32.totalorder %s1808_s25, 8 }
  0x1a   : > { %p1944_p2 = por %p152_p0, %p151_p12  ;;  %s186_s18 = sand.u32 1, %s1788_s20  }
  0x1b   : > { %s2449_s13 = scalar_select %p1939_p13, 1, 0 }
  0x1c   : > { %s2450_s14 = scalar_select %p1944_p2, 1, 0 }
  0x1d   : > { %s1391_s30 = sshll.u32 %s186_s18, 1  ;;  %s1459_s5 = sshll.u32 %s1800_s23, 5 }
  0x1e   : > { %s1953_s26 = scalar_lea.hbm %s2436_s3, %s1459_s5  ;;  %s190_s11 = scalar_lea.vmem [#allocation2], %s1391_s30 }
  0x1f   : > { %s198_s29 = sshll.u32 %s190_s11, 4  ;;  %p1959_p4 = pnand %p1554_p1, %p1915_p3  ;;  %s1955_s29 = int_to_ptr.vmem [resolvable:$true] %s198_s29 }
  0x20   : > { %s187_s9 = scalar_lea.sflag [#allocation3], %s186_s18  ;;  %s1656_s5 = scalar_lea.hbm %s1953_s26, 32 }
  0x21   : > { %p1657_p7 = scmp.ne.s32.totalorder %s1953_s26, %s1656_s5  ;;  %p1658_p9 = pneg %p1959_p4 }
  0x22   : > { %s1661_s6 = scalar_lea.hbm %s2436_s3, 128  ;;  %p1662_p3 = scmp.lt.u32.totalorder %s1953_s26, %s2436_s3 }
  0x23   : > { %p1659_p10 = pnand %p1658_p9, %p1657_p7  ;;  %p1663_p12 = scmp.lt.u32.totalorder %s1661_s6, %s1656_s5 }
  0x24   : > { %p1665_p1 = scmp.lt.u32.totalorder %s1656_s5, %s1953_s26 }
  0x25   : > { %p1660_p11 = pneg %p1659_p10  ;;  %p1664_p0 = por %p1663_p12, %p1662_p3 }
  0x27   : > { %p1666_p5 = por %p1665_p1, %p1664_p0 }
  0x29   : > { %p1667_p6 = pnand %p1666_p5, %p1660_p11 }
  0x2b   : > { %1670 = shalt.err (!%p1667_p6)
}
  0x2c   : > { %s1671_s18 = scalar_lea.vmem %s1955_s29, 32  ;;  %s1810_s30 = smov [#allocation2]  }
  0x2d   : > { %p1672_p7 = scmp.ne.s32.totalorder %s1955_s29, %s1671_s18  ;;  %s1676_s10 = sshll.u32 %s1810_s30, 4  ;;  %s1677_s10 = int_to_ptr.vmem [resolvable:$false] %s1676_s10 }
  0x2e   : > { %s1678_s28 = scalar_lea.vmem %s1677_s10, 64  ;;  %p1679_p13 = scmp.lt.s32.totalorder %s1955_s29, %s1677_s10 }
  0x2f   : > { %p1674_p10 = pnand %p1672_p7, %p1658_p9  ;;  %p1680_p3 = scmp.lt.s32.totalorder %s1678_s28, %s1671_s18 }
  0x31   : > { %p1675_p2 = pneg %p1674_p10  ;;  %p1681_p12 = por %p1680_p3, %p1679_p13 }
  0x33   : > { %p1682_p0 = pnand %p1681_p12, %p1675_p2 }
  0x35   : > { %1685 = shalt.err (!%p1682_p0)
}
  0x36   : > { %1549 = dma.hbm_to_vmem [thread:$0]  (!%p1959_p4), %s1953_s26, 32, %s1955_s29, %s187_s9  }
  0x37   : > { %p2452_p5 = scmp.lt.s32.totalorder %s1808_s25, 9  ;;  %p2453_p6 = scmp.ge.s32.totalorder %s1808_s25, 1 }
  0x39   : > { %p204_p9 = pnand %p2453_p6, %p2452_p5 }
  0x3a   : > { %s209_s5 = sand.u32 (!%p204_p9), 1, %s1784_s19  }
  0x3b   : > { %207 = sbr.rel (%p204_p9) target bundleno = 921 (0x399), region = 36  ;;  %s1995_s6 = sshll.u32 (!%p204_p9), %s209_s5, 1 }
  0x3c   : > { %s210_s11 = scalar_lea.sflag (!%p204_p9), [#allocation3], %s209_s5 }
  0x42   : > { %1759 = dma.done.wait (%p1925_p8), %s210_s11, 32  }
  0x43   : > { %1761 = vsyncadd (%p1925_p8), %s210_s11, 4294967264  ;;  %p243_p13 = scmp.lt.s32.totalorder %s1796_s22, 1  ;;  %s1398_s29 = sshll.u32 %s1792_s21, 7  ;;  %v1811_v0 = vmov 0.0   ;;  %vm283_vm0 = vcmask 261120   ;;  %v2012_v1 = vld [vmem:[%s2434_s1 + $0x40] sm:$0xff] }
  0x44   : > { %s249_s26 = sshra.s32 %s1398_s29, 7  ;;  %402 = vmatprep.mubr.f32.mxu0 %v1811_v0  ;;  %1502 = vmatprep.mubr.msk.f32.mxu1 %vm283_vm0, %v2012_v1  ;;  %v2019_v20 = vld [vmem:[%s2434_s1] sm:$0xff]  ;;  %v274_v21 = vld [vmem:[%s2434_s1 + $0x48] sm:$0xff]  ;;  %v275_v22 = vld [vmem:[%s2434_s1 + $0x50] sm:$0xff]  ;;  %s1817_s10 = smov 95   ;;  %vm666_vm1 = vcmask 1039360  }
  0x45   : > { %s244_s27 = scalar_select %p243_p13, %s1796_s22, 1  ;;  %v266_v23 = vld [vmem:[%s2434_s1 + $0x8] sm:$0xff]  ;;  %v276_v24 = vld [vmem:[%s2434_s1 + $0x58] sm:$0xff]  ;;  %v277_v25 = vld [vmem:[%s2434_s1 + $0x60] sm:$0xff]  ;;  %vm689_vm2 = vcmask 1031168   ;;  %vm712_vm3 = vcmask 785408  }
  0x46   : > { %s1399_s30 = sshll.u32 %s249_s26, 3  ;;  %v267_v26 = vld [vmem:[%s2434_s1 + $0x10] sm:$0xff]  ;;  %v278_v27 = vld [vmem:[%s2434_s1 + $0x68] sm:$0xff]  ;;  %v268_v29 = vld [vmem:[%s2434_s1 + $0x18] sm:$0xff]  ;;  %s1812_s26 = smov 127   ;;  %vm787_vm4 = vcmask 523264  }
  0x47   : > { %s1541_s9 = smul.u32 192, %s244_s27  ;;  %v279_v28 = vld [vmem:[%s2434_s1 + $0x70] sm:$0xff]  ;;  %v280_v30 = vld [vmem:[%s2434_s1 + $0x78] sm:$0xff]  ;;  %v281_v31 = vld [vmem:[%s2434_s1 + $0x80] sm:$0xff]  ;;  %s1813_s27 = smov 64   ;;  %vm735_vm5 = vcmask 777216  }
  0x48   : > { %v269_v32 = vld [vmem:[%s2434_s1 + $0x20] sm:$0xff]  ;;  %v282_v33 = vld [vmem:[%s2434_s1 + $0x88] sm:$0xff]  ;;  %v271_v35 = vld [vmem:[%s2434_s1 + $0x30] sm:$0xff]  ;;  %s2441_s28 = smov 62   ;;  %vm758_vm6 = vcmask 769024   ;;  %vm818_vm7 = vcmask 515072  }
  0x49   : > { %s247_s5 = scalar_lea.vmem %s2433_s0, %s1541_s9  ;;  %v270_v34 = vld [vmem:[%s2434_s1 + $0x28] sm:$0xff]  ;;  %v272_v36 = vld [vmem:[%s2434_s1 + $0x38] sm:$0xff]  ;;  %s1814_s9 = smov 126   ;;  %vm849_vm8 = vcmask 506880   ;;  %vm900_vm9 = vcmask 130048  }
  0x4a   : > { %s252_s18 = scalar_lea.vmem %s247_s5, %s1399_s30  ;;  %s1816_s30 = smov 96  }
  0x4b   : > { %v254_v2 = vld [vmem:[%s252_s18 + $0x8] sm:$0xff]  ;;  %v257_v3 = vld [vmem:[%s252_s18 + $0x38] sm:$0xff]  ;;  %v255_v4 = vld [vmem:[%s252_s18 + $0x10] sm:$0xff]  ;;  %s1819_s5 = smov 94   ;;  %s2454_s8 = scalar_lea.vmem [#allocation2], %s1995_s6 }
  0x4c   : > { %v1517_v5 = vpack.c.bf16 %v257_v3, %v254_v2  ;;  %v258_v6 = vld [vmem:[%s252_s18 + $0x40] sm:$0xff]  ;;  %v256_v8 = vld [vmem:[%s252_s18 + $0x30] sm:$0xff]  ;;  %v260_v11 = vld [vmem:[%s252_s18 + $0x68] sm:$0xff]  ;;  %p2457_p2 = scmp.ne.s32.totalorder %s2449_s13, 0 }
  0x4d   : > { %v253_v7 = vld [vmem:[%s252_s18] sm:$0xff]  ;;  %v1525_v9 = vpack.c.bf16 %v258_v6, %v255_v4  ;;  %v263_v12 = vld [vmem:[%s252_s18 + $0x98] sm:$0xff]  ;;  %v261_v13 = vld [vmem:[%s252_s18 + $0x70] sm:$0xff] }
  0x4e   : > { %v1519_v10 = vpack.c.bf16 %v256_v8, %v253_v7  ;;  %1518 = vmatprep.subr.bf16.mxu0 %v1517_v5  ;;  %v1521_v14 = vpack.c.bf16 %v263_v12, %v260_v11  ;;  %v264_v15 = vld [vmem:[%s252_s18 + $0xa0] sm:$0xff]  ;;  %v262_v17 = vld [vmem:[%s252_s18 + $0x90] sm:$0xff] }
  0x4f   : > { %v259_v16 = vld [vmem:[%s252_s18 + $0x60] sm:$0xff]  ;;  %1537 = vmatprep.subr.bf16.mxu1 %v1525_v9  ;;  %v1529_v18 = vpack.c.bf16 %v264_v15, %v261_v13  ;;  %s2443_s18 = smov 63  }
  0x50   : > { %1520 = vmatpush1.bf16.msra.mxu0 %v1519_v10  ;;  %v1523_v19 = vpack.c.bf16 %v262_v17, %v259_v16  ;;  %1539 = vmatpush3.bf16.msra.mxu1 %v1525_v9 }
  0x51   : > { %1522 = vmatprep.subr.bf16.mxu0 %v1521_v14  ;;  %1538 = vmatprep.subr.bf16.mxu1 %v1529_v18 }
  0x54   : > { %1524 = vmatpush1.bf16.msra.mxu0 %v1523_v19  ;;  %1540 = vmatpush3.bf16.msra.mxu1 %v1529_v18 }
  0x55   : > { %1526 = vmatprep.subr.bf16.mxu0 %v1525_v9 }
  0x57   : > { %1400 = vmatmul.mubr.msk.f32.vlgmr.msra.gmra.mrb[0].mxu0 %vm283_vm0, %v2019_v20  ;;  %1503 = vmatmul.mubr.msk.f32.vlgmr.msra.gmra.mrb[0].mxu1 %vm283_vm0, %v274_v21 }
  0x58   : > { %408 = vmatprep.mubr.f32.mxu0 %v1811_v0  ;;  %1505 = vmatprep.mubr.msk.f32.mxu1 %vm283_vm0, %v275_v22 }
  0x59   : > { %1528 = vmatpush3.bf16.msra.mxu0 %v1525_v9 }
  0x5a   : > { %1530 = vmatprep.subr.bf16.mxu0 %v1529_v18 }
  0x5b   : > { %1401 = vmatmul.mubr.msk.f32.gmra.mrb[2].mxu0 %vm283_vm0, %v266_v23  ;;  %1506 = vmatmul.mubr.msk.f32.gmra.mrb[2].mxu1 %vm283_vm0, %v276_v24 }
  0x5c   : > { %414 = vmatprep.mubr.f32.mxu0 %v1811_v0  ;;  %1508 = vmatprep.mubr.msk.f32.mxu1 %vm283_vm0, %v277_v25 }
  0x5d   : > { %1532 = vmatpush3.bf16.msra.mxu0 %v1529_v18 }
  0x5f   : > { %1402 = vmatmul.mubr.msk.f32.gmra.mrb[4].mxu0 %vm283_vm0, %v267_v26  ;;  %1509 = vmatmul.mubr.msk.f32.gmra.mrb[4].mxu1 %vm283_vm0, %v278_v27 }
  0x60   : > { %420 = vmatprep.mubr.f32.mxu0 %v1811_v0  ;;  %1511 = vmatprep.mubr.msk.f32.mxu1 %vm283_vm0, %v279_v28 }
  0x63   : > { %1403 = vmatmul.mubr.msk.f32.gmra.mrb[6].mxu0 %vm283_vm0, %v268_v29  ;;  %1512 = vmatmul.mubr.msk.f32.gmra.mrb[6].mxu1 %vm283_vm0, %v280_v30 }
  0x64   : > { %426 = vmatprep.mubr.f32.mxu0 %v1811_v0  ;;  %1514 = vmatprep.mubr.msk.f32.mxu1 %vm283_vm0, %v281_v31 }
  0x67   : > { %1404 = vmatmul.mubr.msk.f32.gmra.mrb[8].mxu0 %vm283_vm0, %v269_v32  ;;  %1515 = vmatmul.mubr.msk.f32.gmra.mrb[8].mxu1 %vm283_vm0, %v282_v33 }
  0x68   : > { %432 = vmatprep.mubr.f32.mxu0 %v1811_v0  ;;  %1019 = vmatprep.mubr.f32.mxu1 %v1811_v0 }
  0x6b   : > { %1405 = vmatmul.mubr.msk.f32.gmra.mrb[10].mxu0 %vm283_vm0, %v270_v34 }
  0x6c   : > { %438 = vmatprep.mubr.f32.mxu0 %v1811_v0 }
  0x6f   : > { %1406 = vmatmul.mubr.msk.f32.gmra.mrb[12].mxu0 %vm283_vm0, %v271_v35 }
  0x70   : > { %444 = vmatprep.mubr.f32.mxu0 %v1811_v0 }
  0x73   : > { %1407 = vmatmul.mubr.msk.f32.gmra.mrb[14].mxu0 %vm283_vm0, %v272_v36 }
  0x74   : > { %450 = vmatprep.mubr.f32.mxu0 %v1811_v0 }
  0x77   : > { %1408 = vmatmul.mubr.msk.f32.gmra.mrb[16].mxu0 %vm283_vm0, %v2012_v1 }
  0x78   : > { %456 = vmatprep.mubr.f32.mxu0 %v1811_v0 }
  0x7b   : > { %1409 = vmatmul.mubr.msk.f32.gmra.mrb[18].mxu0 %vm283_vm0, %v274_v21 }
  0x7c   : > { %462 = vmatprep.mubr.f32.mxu0 %v1811_v0 }
  0x7f   : > { %1410 = vmatmul.mubr.msk.f32.gmra.mrb[20].mxu0 %vm283_vm0, %v275_v22 }
  0x80   : > { %468 = vmatprep.mubr.f32.mxu0 %v1811_v0 }
  0x83   : > { %1411 = vmatmul.mubr.msk.f32.gmra.mrb[22].mxu0 %vm283_vm0, %v276_v24 }
  0x84   : > { %474 = vmatprep.mubr.f32.mxu0 %v1811_v0 }
  0x87   : > { %1412 = vmatmul.mubr.msk.f32.gmra.mrb[24].mxu0 %vm283_vm0, %v277_v25 }
  0x88   : > { %480 = vmatprep.mubr.f32.mxu0 %v1811_v0 }
  0x8b   : > { %1413 = vmatmul.mubr.msk.f32.gmra.mrb[26].mxu0 %vm283_vm0, %v278_v27 }
  0x8c   : > { %486 = vmatprep.mubr.f32.mxu0 %v1811_v0 }
  0x8f   : > { %1414 = vmatmul.mubr.msk.f32.gmra.mrb[28].mxu0 %vm283_vm0, %v279_v28 }
  0x90   : > { %492 = vmatprep.mubr.f32.mxu0 %v1811_v0 }
  0x93   : > { %1415 = vmatmul.mubr.msk.f32.gmra.mrb[30].mxu0 %vm283_vm0, %v280_v30 }
  0x94   : > { %498 = vmatprep.mubr.f32.mxu0 %v1811_v0 }
  0x97   : > { %1416 = vmatmul.mubr.msk.f32.gmra.mrb[32].mxu0 %vm283_vm0, %v281_v31 }
  0x98   : > { %504 = vmatprep.mubr.f32.mxu0 %v1811_v0 }
  0x9b   : > { %1417 = vmatmul.mubr.msk.f32.gmra.mrb[34].mxu0 %vm283_vm0, %v282_v33 }
  0x9c   : > { %1490 = vmatprep.mubr.msk.f32.mxu0 %vm283_vm0, %v2019_v20 }
  0x9f   : > { %1491 = vmatmul.mubr.msk.f32.vlgmr.msra.gmra.mrb[36].mxu0 %vm283_vm0, %v266_v23 }
  0xa0   : > { %1493 = vmatprep.mubr.msk.f32.mxu0 %vm283_vm0, %v267_v26 }
  0xa3   : > { %1494 = vmatmul.mubr.msk.f32.gmra.mrb[38].mxu0 %vm283_vm0, %v268_v29 }
  0xa4   : > { %1496 = vmatprep.mubr.msk.f32.mxu0 %vm283_vm0, %v269_v32 }
  0xa7   : > { %1497 = vmatmul.mubr.msk.f32.gmra.mrb[40].mxu0 %vm283_vm0, %v270_v34 }
  0xa8   : > { %1499 = vmatprep.mubr.msk.f32.mxu0 %vm283_vm0, %v271_v35 }
  0xab   : > { %1500 = vmatmul.mubr.msk.f32.gmra.mrb[42].mxu0 %vm283_vm0, %v272_v36 }
 0x12a   : > { %v2125_v37 = vpop.f32.mrb[0].mxu0  ;;  %v1504_v38 = vpop.f32.mrb[0].mxu1 }
 0x12b   : > { %v2127_v39 = vpop.f32.mrb[1].mxu0  ;;  %v609_v40 = vpop.f32.mrb[1].mxu1 }
 0x12e   : > { %v2129_v41 = vpop.f32.mrb[2].mxu0  ;;  %v1507_v42 = vpop.f32.mrb[2].mxu1 }
 0x12f   : > { %v2131_v43 = vpop.f32.mrb[3].mxu0  ;;  %v617_v44 = vpop.f32.mrb[3].mxu1 }
 0x132   : > { %v416_v45 = vpop.f32.mrb[4].mxu0  ;;  %v1510_v46 = vpop.f32.mrb[4].mxu1 }
 0x133   : > { %658 = vrot.lane.b32.xlu0 %v416_v45, %s1812_s26  ;;  %v418_v47 = vpop.f32.mrb[5].mxu0  ;;  %785 = vrot.lane.b32.xlu1 %v1510_v46, %s1813_s27  ;;  %v625_v48 = vpop.f32.mrb[5].mxu1 }
 0x136   : > { %v422_v49 = vpop.f32.mrb[6].mxu0  ;;  %v1513_v51 = vpop.f32.mrb[6].mxu1 }
 0x137   : > { %660 = vrot.lane.b32.xlu0 %v418_v47, %s1812_s26  ;;  %v424_v50 = vpop.f32.mrb[7].mxu0  ;;  %779 = vrot.lane.b32.xlu1 %v625_v48, %s1813_s27  ;;  %v635_v52 = vpop.f32.mrb[7].mxu1 }
 0x13a   : > { %v428_v53 = vpop.f32.mrb[8].mxu0  ;;  %v1516_v55 = vpop.f32.mrb[8].mxu1 }
 0x13b   : > { %681 = vrot.lane.b32.xlu0 %v428_v53, %s1814_s9  ;;  %v430_v54 = vpop.f32.mrb[9].mxu0  ;;  %662 = vrot.lane.b32.xlu1 %v422_v49, %s1812_s26  ;;  %v645_v56 = vpop.f32.mrb[9].mxu1 }
 0x13e   : > { %v434_v57 = vpop.f32.mrb[10].mxu0 }
 0x13f   : > { %685 = vrot.lane.b32.xlu0 %v434_v57, %s1814_s9  ;;  %v436_v58 = vpop.f32.mrb[11].mxu0  ;;  %816 = vrot.lane.b32.xlu1 %v1513_v51, %s2443_s18 }
 0x142   : > { %v440_v59 = vpop.f32.mrb[12].mxu0 }
 0x143   : > { %704 = vrot.lane.b32.xlu0 %v440_v59, %s1816_s30  ;;  %v442_v60 = vpop.f32.mrb[13].mxu0  ;;  %664 = vrot.lane.b32.xlu1 %v424_v50, %s1812_s26 }
 0x146   : > { %v446_v61 = vpop.f32.mrb[14].mxu0 }
 0x147   : > { %708 = vrot.lane.b32.xlu0 %v446_v61, %s1816_s30  ;;  %v448_v62 = vpop.f32.mrb[15].mxu0  ;;  %810 = vrot.lane.b32.xlu1 %v635_v52, %s2443_s18 }
 0x14a   : > { %v452_v63 = vpop.f32.mrb[16].mxu0 }
 0x14b   : > { %727 = vrot.lane.b32.xlu0 %v452_v63, %s1817_s10  ;;  %v454_v1 = vpop.f32.mrb[17].mxu0  ;;  %847 = vrot.lane.b32.xlu1 %v1516_v55, %s2441_s28 }
 0x14e   : > { %v458_v2 = vpop.f32.mrb[18].mxu0 }
 0x14f   : > { %731 = vrot.lane.b32.xlu0 %v458_v2, %s1817_s10  ;;  %v460_v3 = vpop.f32.mrb[19].mxu0  ;;  %683 = vrot.lane.b32.xlu1 %v430_v54, %s1814_s9 }
 0x152   : > { %v464_v4 = vpop.f32.mrb[20].mxu0 }
 0x153   : > { %750 = vrot.lane.b32.xlu0 %v464_v4, %s1819_s5  ;;  %v466_v5 = vpop.f32.mrb[21].mxu0  ;;  %841 = vrot.lane.b32.xlu1 %v645_v56, %s2441_s28 }
 0x156   : > { %v470_v6 = vpop.f32.mrb[22].mxu0 }
 0x157   : > { %754 = vrot.lane.b32.xlu0 %v470_v6, %s1819_s5  ;;  %v472_v7 = vpop.f32.mrb[23].mxu0  ;;  %687 = vrot.lane.b32.xlu1 %v436_v58, %s1814_s9 }
 0x15a   : > { %v476_v8 = vpop.f32.mrb[24].mxu0 }
 0x15b   : > { %775 = vrot.lane.b32.xlu0 %v476_v8, %s1813_s27  ;;  %v478_v9 = vpop.f32.mrb[25].mxu0  ;;  %706 = vrot.lane.b32.xlu1 %v442_v60, %s1816_s30  ;;  %v868_v8 = vlaneseq }
 0x15e   : > { %v482_v10 = vpop.f32.mrb[26].mxu0 }
 0x15f   : > { %777 = vrot.lane.b32.xlu0 %v478_v9, %s1813_s27  ;;  %v484_v11 = vpop.f32.mrb[27].mxu0  ;;  %710 = vrot.lane.b32.xlu1 %v448_v62, %s1816_s30 }
 0x162   : > { %v488_v12 = vpop.f32.mrb[28].mxu0 }
 0x163   : > { %783 = vrot.lane.b32.xlu0 %v484_v11, %s1813_s27  ;;  %v490_v13 = vpop.f32.mrb[29].mxu0  ;;  %729 = vrot.lane.b32.xlu1 %v454_v1, %s1817_s10 }
 0x166   : > { %v494_v14 = vpop.f32.mrb[30].mxu0 }
 0x167   : > { %806 = vrot.lane.b32.xlu0 %v488_v12, %s2443_s18  ;;  %v496_v15 = vpop.f32.mrb[31].mxu0  ;;  %733 = vrot.lane.b32.xlu1 %v460_v3, %s1817_s10 }
 0x16a   : > { %v500_v16 = vpop.f32.mrb[32].mxu0 }
 0x16b   : > { %808 = vrot.lane.b32.xlu0 %v490_v13, %s2443_s18  ;;  %v502_v17 = vpop.f32.mrb[33].mxu0  ;;  %752 = vrot.lane.b32.xlu1 %v466_v5, %s1819_s5 }
 0x16e   : > { %v506_v18 = vpop.f32.mrb[34].mxu0 }
 0x16f   : > { %814 = vrot.lane.b32.xlu0 %v496_v15, %s2443_s18  ;;  %v508_v19 = vpop.f32.mrb[35].mxu0  ;;  %756 = vrot.lane.b32.xlu1 %v472_v7, %s1819_s5 }
 0x172   : > { %v1492_v20 = vpop.f32.mrb[36].mxu0 }
 0x173   : > { %839 = vrot.lane.b32.xlu0 %v502_v17, %s2441_s28  ;;  %v577_v21 = vpop.f32.mrb[37].mxu0  ;;  %781 = vrot.lane.b32.xlu1 %v482_v10, %s1813_s27 }
 0x176   : > { %v1495_v22 = vpop.f32.mrb[38].mxu0 }
 0x177   : > { %845 = vrot.lane.b32.xlu0 %v508_v19, %s2441_s28  ;;  %v585_v23 = vpop.f32.mrb[39].mxu0  ;;  %812 = vrot.lane.b32.xlu1 %v494_v14, %s2443_s18 }
 0x17a   : > { %v1498_v24 = vpop.f32.mrb[40].mxu0 }
 0x17b   : > { %837 = vrot.lane.b32.xlu0 %v500_v16, %s2441_s28  ;;  %v593_v25 = vpop.f32.mrb[41].mxu0  ;;  %843 = vrot.lane.b32.xlu1 %v506_v18, %s2441_s28  ;;  %v869_v24 = vshrl.u32 %v868_v8, 7 }
 0x17e   : > { %v1501_v26 = vpop.f32.mrb[42].mxu0 }
 0x17f   : > { %v601_v27 = vpop.f32.mrb[43].mxu0 }
 0x1a5   : > { %v659_v28 = vpop.permute.xlu0 %658  ;;  %v2171_v29 = vpop.permute.xlu1 %785 }
 0x1a9   : > { %v661_v30 = vpop.permute.xlu0 %660  ;;  %v780_v31 = vpop.permute.xlu1 %779 }
 0x1aa   : > { %v674_v58 = vadd.f32 %v661_v30, %v2127_v39  ;;  %v667_v61 = vsel %vm666_vm1, %v659_v28, %v661_v30 }
 0x1ab   : > { %v673_v3 = vadd.f32 %v667_v61, %v2125_v37 }
 0x1ad   : > { %v682_v32 = vpop.permute.xlu0 %681  ;;  %v663_v33 = vpop.permute.xlu1 %662 }
 0x1b1   : > { %v686_v34 = vpop.permute.xlu0 %685  ;;  %v2173_v35 = vpop.permute.xlu1 %816 }
 0x1b5   : > { %v705_v36 = vpop.permute.xlu0 %704  ;;  %v665_v38 = vpop.permute.xlu1 %664 }
 0x1b6   : > { %v676_v63 = vadd.f32 %v665_v38, %v2131_v43  ;;  %v668_v9 = vsel %vm666_vm1, %v663_v33, %v665_v38 }
 0x1b7   : > { %v675_v18 = vadd.f32 %v668_v9, %v2129_v41 }
 0x1b9   : > { %v709_v40 = vpop.permute.xlu0 %708  ;;  %v811_v42 = vpop.permute.xlu1 %810 }
 0x1bd   : > { %v728_v44 = vpop.permute.xlu0 %727  ;;  %v2175_v45 = vpop.permute.xlu1 %847 }
 0x1c1   : > { %v732_v46 = vpop.permute.xlu0 %731  ;;  %v684_v47 = vpop.permute.xlu1 %683 }
 0x1c2   : > { %v697_v59 = vadd.f32 %v684_v47, %v674_v58  ;;  %v690_v2 = vsel %vm689_vm2, %v682_v32, %v684_v47  ;;  %v870_v58 = vsub.s32 0, %v869_v24 }
 0x1c3   : > { %v696_v10 = vadd.f32 %v690_v2, %v673_v3 }
 0x1c5   : > { %v751_v48 = vpop.permute.xlu0 %750  ;;  %v842_v49 = vpop.permute.xlu1 %841 }
 0x1c9   : > { %v755_v50 = vpop.permute.xlu0 %754  ;;  %v688_v51 = vpop.permute.xlu1 %687 }
 0x1ca   : > { %v699_v4 = vadd.f32 %v688_v51, %v676_v63  ;;  %v691_v37 = vsel %vm689_vm2, %v686_v34, %v688_v51 }
 0x1cb   : > { %v698_v25 = vadd.f32 %v691_v37, %v675_v18  ;;  %v883_v37 = vld [vmem:[%s2435_s2 + $0x8] sm:$0xff]  ;;  %v888_v18 = vld [vmem:[%s2435_s2 + $0x30] sm:$0xff] }
 0x1cd   : > { %v776_v52 = vpop.permute.xlu0 %775  ;;  %v707_v53 = vpop.permute.xlu1 %706 }
 0x1ce   : > { %v720_v1 = vadd.f32 %v707_v53, %v697_v59  ;;  %v713_v6 = vsel %vm712_vm3, %v705_v36, %v707_v53 }
 0x1cf   : > { %v719_v14 = vadd.f32 %v713_v6, %v696_v10 }
 0x1d1   : > { %v778_v54 = vpop.permute.xlu0 %777  ;;  %v711_v55 = vpop.permute.xlu1 %710 }
 0x1d2   : > { %v722_v43 = vadd.f32 %v711_v55, %v699_v4  ;;  %v789_v12 = vsel %vm787_vm4, %v778_v54, %v780_v31  ;;  %v714_v21 = vsel %vm712_vm3, %v709_v40, %v711_v55  ;;  %v874_v40 = vsub.s32 1, %v869_v24  ;;  %v894_v24 = vld [vmem:[%s2435_s2 + $0x60] sm:$0xff] }
 0x1d3   : > { %v721_v33 = vadd.f32 %v714_v21, %v698_v25  ;;  %v788_v47 = vsel %vm787_vm4, %v776_v52, %v778_v54  ;;  %v891_v21 = vld [vmem:[%s2435_s2 + $0x48] sm:$0xff] }
 0x1d4   : > { %v895_v25 = vld [vmem:[%s2435_s2 + $0x68] sm:$0xff] }
 0x1d5   : > { %v2177_v56 = vpop.permute.xlu0 %783  ;;  %v730_v57 = vpop.permute.xlu1 %729 }
 0x1d6   : > { %v743_v5 = vadd.f32 %v730_v57, %v720_v1  ;;  %v736_v13 = vsel %vm735_vm5, %v728_v44, %v730_v57  ;;  %v791_v26 = vsel %vm787_vm4, %v2177_v56, %v2171_v29 }
 0x1d7   : > { %v742_v22 = vadd.f32 %v736_v13, %v719_v14  ;;  %v882_v13 = vld [vmem:[%s2435_s2] sm:$0xff]  ;;  %v884_v14 = vld [vmem:[%s2435_s2 + $0x10] sm:$0xff] }
 0x1d9   : > { %v2180_v60 = vpop.permute.xlu0 %806  ;;  %v734_v62 = vpop.permute.xlu1 %733 }
 0x1da   : > { %v745_v15 = vadd.f32 %v734_v62, %v722_v43  ;;  %v737_v28 = vsel %vm735_vm5, %v732_v46, %v734_v62  ;;  %v866_v46 = vld [vmem:[%s2454_s8] sm:$0x3] }
 0x1db   : > { %v744_v29 = vadd.f32 %v737_v28, %v721_v33  ;;  %v875_v59 = vrot.slane %v866_v46, %v874_v40  ;;  %v871_v3 = vrot.slane %v866_v46, %v870_v58  ;;  %v898_v28 = vld [vmem:[%s2435_s2 + $0x80] sm:$0xff] }
 0x1dd   : > { %v809_v39 = vpop.permute.xlu0 %808  ;;  %v753_v7 = vpop.permute.xlu1 %752 }
 0x1de   : > { %v766_v11 = vadd.f32 %v753_v7, %v743_v5  ;;  %v759_v19 = vsel %vm758_vm6, %v751_v48, %v753_v7  ;;  %v820_v27 = vsel %vm818_vm7, %v809_v39, %v811_v42 }
 0x1df   : > { %v765_v41 = vadd.f32 %v759_v19, %v742_v22  ;;  %v889_v19 = vld [vmem:[%s2435_s2 + $0x38] sm:$0xff]  ;;  %v892_v22 = vld [vmem:[%s2435_s2 + $0x50] sm:$0xff] }
 0x1e0   : > { %v797_v16 = vadd.f32 %v789_v12, %v766_v11 }
 0x1e1   : > { %v815_v17 = vpop.permute.xlu0 %814  ;;  %v757_v20 = vpop.permute.xlu1 %756  ;;  %v796_v48 = vadd.f32 %v788_v47, %v765_v41  ;;  %v899_v41 = vld [vmem:[%s2435_s2 + $0x88] sm:$0xff] }
 0x1e2   : > { %v768_v23 = vadd.f32 %v757_v20, %v745_v15  ;;  %v828_v30 = vadd.f32 %v820_v27, %v797_v16  ;;  %v760_v38 = vsel %vm758_vm6, %v755_v50, %v757_v20  ;;  %v822_v42 = vsel %vm818_vm7, %v815_v17, %v2173_v35  ;;  %v885_v15 = vld [vmem:[%s2435_s2 + $0x18] sm:$0xff]  ;;  %v886_v16 = vld [vmem:[%s2435_s2 + $0x20] sm:$0xff] }
 0x1e3   : > { %v767_v57 = vadd.f32 %v760_v38, %v744_v29  ;;  %v819_v35 = vsel %vm818_vm7, %v2180_v60, %v809_v39  ;;  %v890_v20 = vld [vmem:[%s2435_s2 + $0x40] sm:$0xff]  ;;  %v897_v27 = vld [vmem:[%s2435_s2 + $0x78] sm:$0xff] }
 0x1e4   : > { %v799_v31 = vadd.f32 %v791_v26, %v768_v23  ;;  %v827_v63 = vadd.f32 %v819_v35, %v796_v48  ;;  %v893_v23 = vld [vmem:[%s2435_s2 + $0x58] sm:$0xff]  ;;  %v896_v26 = vld [vmem:[%s2435_s2 + $0x70] sm:$0xff] }
 0x1e5   : > { %v840_v32 = vpop.permute.xlu0 %839  ;;  %v782_v34 = vpop.permute.xlu1 %781 }
 0x1e6   : > { %v851_v36 = vsel %vm849_vm8, %v840_v32, %v842_v49  ;;  %v830_v51 = vadd.f32 %v822_v42, %v799_v31  ;;  %v790_v53 = vsel %vm787_vm4, %v782_v34, %v2177_v56 }
 0x1e7   : > { %v859_v44 = vadd.f32 %v851_v36, %v828_v30  ;;  %v798_v62 = vadd.f32 %v790_v53, %v767_v57 }
 0x1e9   : > { %v846_v55 = vpop.permute.xlu0 %845  ;;  %v813_v49 = vpop.permute.xlu1 %812  ;;  %v863_v52 = vmax.f32 %v859_v44, 0.0 }
 0x1ea   : > { %v853_v50 = vsel %vm849_vm8, %v846_v55, %v2175_v45  ;;  %v821_v54 = vsel %vm818_vm7, %v813_v49, %v815_v17  ;;  %v887_v17 = vld [vmem:[%s2435_s2 + $0x28] sm:$0xff] }
 0x1eb   : > { %v861_v61 = vadd.f32 %v853_v50, %v830_v51  ;;  %v829_v56 = vadd.f32 %v821_v54, %v798_v62  ;;  %v879_v6 = vmul.f32 %v875_v59, %v863_v52 }
 0x1ed   : > { %v865_v1 = vmax.f32 %v861_v61, 0.0  ;;  %v838_v2 = vpop.permute.xlu0 %837  ;;  %v844_v4 = vpop.permute.xlu1 %843 }
 0x1ee   : > { %v850_v5 = vsel %vm849_vm8, %v838_v2, %v840_v32  ;;  %v852_v7 = vsel %vm849_vm8, %v844_v4, %v846_v55 }
 0x1ef   : > { %v881_v45 = vmul.f32 %v875_v59, %v865_v1  ;;  %v858_v8 = vadd.f32 %v850_v5, %v827_v63  ;;  %v860_v9 = vadd.f32 %v852_v7, %v829_v56 }
 0x1f1   : > { %v862_v10 = vmax.f32 %v858_v8, 0.0  ;;  %v1533_v43 = vpack.c.bf16 %v881_v45, %v879_v6  ;;  %v864_v11 = vmax.f32 %v860_v9, 0.0 }
 0x1f3   : > { %v878_v12 = vmul.f32 %v871_v3, %v862_v10  ;;  %1534 = vmatprep.subr.bf16.mxu1 %v1533_v43  ;;  %v880_v60 = vmul.f32 %v871_v3, %v864_v11 }
 0x1f5   : > { %v1535_v39 = vpack.c.bf16 %v880_v60, %v878_v12 }
 0x1f7   : > { %1536 = vmatpush1.bf16.msra.mxu1 %v1535_v39 }
 0x1fa   : > { %1436 = vmatmul.mubr.msk.f32.vlgmr.msra.gmra.mrb[10].mxu1 %vm900_vm9, %v882_v13 }
 0x1fb   : > { %1024 = vmatprep.mubr.f32.mxu1 %v1811_v0 }
 0x1fe   : > { %1437 = vmatmul.mubr.msk.f32.gmra.mrb[12].mxu1 %vm900_vm9, %v883_v37 }
 0x1ff   : > { %1029 = vmatprep.mubr.f32.mxu1 %v1811_v0 }
 0x202   : > { %1438 = vmatmul.mubr.msk.f32.gmra.mrb[14].mxu1 %vm900_vm9, %v884_v14 }
 0x203   : > { %1035 = vmatprep.mubr.f32.mxu1 %v1811_v0 }
 0x206   : > { %1439 = vmatmul.mubr.msk.f32.gmra.mrb[16].mxu1 %vm900_vm9, %v885_v15 }
 0x207   : > { %1041 = vmatprep.mubr.f32.mxu1 %v1811_v0 }
 0x20a   : > { %1440 = vmatmul.mubr.msk.f32.gmra.mrb[18].mxu1 %vm900_vm9, %v886_v16 }
 0x20b   : > { %1047 = vmatprep.mubr.f32.mxu1 %v1811_v0 }
 0x20e   : > { %1441 = vmatmul.mubr.msk.f32.gmra.mrb[20].mxu1 %vm900_vm9, %v887_v17 }
 0x20f   : > { %1053 = vmatprep.mubr.f32.mxu1 %v1811_v0 }
 0x212   : > { %1442 = vmatmul.mubr.msk.f32.gmra.mrb[22].mxu1 %vm900_vm9, %v888_v18 }
 0x213   : > { %1059 = vmatprep.mubr.f32.mxu1 %v1811_v0 }
 0x216   : > { %1443 = vmatmul.mubr.msk.f32.gmra.mrb[24].mxu1 %vm900_vm9, %v889_v19 }
 0x217   : > { %1065 = vmatprep.mubr.f32.mxu1 %v1811_v0 }
 0x21a   : > { %1444 = vmatmul.mubr.msk.f32.gmra.mrb[26].mxu1 %vm900_vm9, %v890_v20 }
 0x21b   : > { %1071 = vmatprep.mubr.f32.mxu1 %v1811_v0 }
 0x21e   : > { %1445 = vmatmul.mubr.msk.f32.gmra.mrb[28].mxu1 %vm900_vm9, %v891_v21 }
 0x21f   : > { %1077 = vmatprep.mubr.f32.mxu1 %v1811_v0 }
 0x222   : > { %1446 = vmatmul.mubr.msk.f32.gmra.mrb[30].mxu1 %vm900_vm9, %v892_v22 }
 0x223   : > { %1083 = vmatprep.mubr.f32.mxu1 %v1811_v0 }
 0x226   : > { %1447 = vmatmul.mubr.msk.f32.gmra.mrb[32].mxu1 %vm900_vm9, %v893_v23 }
 0x227   : > { %1089 = vmatprep.mubr.f32.mxu1 %v1811_v0 }
 0x22a   : > { %1448 = vmatmul.mubr.msk.f32.gmra.mrb[34].mxu1 %vm900_vm9, %v894_v24 }
 0x22b   : > { %1095 = vmatprep.mubr.f32.mxu1 %v1811_v0 }
 0x22e   : > { %1449 = vmatmul.mubr.msk.f32.gmra.mrb[36].mxu1 %vm900_vm9, %v895_v25 }
 0x22f   : > { %1101 = vmatprep.mubr.f32.mxu1 %v1811_v0 }
 0x232   : > { %1450 = vmatmul.mubr.msk.f32.gmra.mrb[38].mxu1 %vm900_vm9, %v896_v26 }
 0x233   : > { %1107 = vmatprep.mubr.f32.mxu1 %v1811_v0 }
 0x236   : > { %1451 = vmatmul.mubr.msk.f32.gmra.mrb[40].mxu1 %vm900_vm9, %v897_v27 }
 0x237   : > { %1113 = vmatprep.mubr.f32.mxu1 %v1811_v0 }
 0x23a   : > { %1452 = vmatmul.mubr.msk.f32.gmra.mrb[42].mxu1 %vm900_vm9, %v898_v28 }
 0x23b   : > { %1119 = vmatprep.mubr.f32.mxu1 %v1811_v0 }
 0x23e   : > { %1453 = vmatmul.mubr.msk.f32.gmra.mrb[44].mxu1 %vm900_vm9, %v899_v41 }
 0x2cd   : > { %v2304_v30 = vpop.f32.mrb[10].mxu1 }
 0x2ce   : > { %v1023_v31 = vpop.f32.mrb[11].mxu1 }
 0x2d1   : > { %v2306_v32 = vpop.f32.mrb[12].mxu1 }
 0x2d2   : > { %v1028_v33 = vpop.f32.mrb[13].mxu1 }
 0x2d5   : > { %v1031_v34 = vpop.f32.mrb[14].mxu1 }
 0x2d6   : > { %v1033_v36 = vpop.f32.mrb[15].mxu1  ;;  %1130 = vrot.lane.b32.xlu0 %v1031_v34, %s1812_s26 }
 0x2d7   : > { %1132 = vrot.lane.b32.xlu1 %v1033_v36, %s1812_s26 }
 0x2d9   : > { %v1037_v38 = vpop.f32.mrb[16].mxu1 }
 0x2da   : > { %v1039_v0 = vpop.f32.mrb[17].mxu1  ;;  %1134 = vrot.lane.b32.xlu0 %v1037_v38, %s1812_s26 }
 0x2db   : > { %1136 = vrot.lane.b32.xlu1 %v1039_v0, %s1812_s26  ;;  %s2455_s26 = smov 63  }
 0x2dd   : > { %v1043_v40 = vpop.f32.mrb[18].mxu1 }
 0x2de   : > { %v1045_v44 = vpop.f32.mrb[19].mxu1  ;;  %1148 = vrot.lane.b32.xlu0 %v1043_v40, %s1814_s9 }
 0x2df   : > { %1150 = vrot.lane.b32.xlu1 %v1045_v44, %s1814_s9 }
 0x2e1   : > { %v1049_v47 = vpop.f32.mrb[20].mxu1 }
 0x2e2   : > { %v1051_v29 = vpop.f32.mrb[21].mxu1  ;;  %1152 = vrot.lane.b32.xlu0 %v1049_v47, %s1814_s9 }
 0x2e3   : > { %1154 = vrot.lane.b32.xlu1 %v1051_v29, %s1814_s9  ;;  %s2456_s9 = smov 62  }
 0x2e5   : > { %v1055_v42 = vpop.f32.mrb[22].mxu1 }
 0x2e6   : > { %v1057_v46 = vpop.f32.mrb[23].mxu1  ;;  %1166 = vrot.lane.b32.xlu0 %v1055_v42, %s1816_s30 }
 0x2e7   : > { %1168 = vrot.lane.b32.xlu1 %v1057_v46, %s1816_s30 }
 0x2e9   : > { %v1061_v48 = vpop.f32.mrb[24].mxu1 }
 0x2ea   : > { %v1063_v51 = vpop.f32.mrb[25].mxu1  ;;  %1170 = vrot.lane.b32.xlu0 %v1061_v48, %s1816_s30 }
 0x2eb   : > { %1172 = vrot.lane.b32.xlu1 %v1063_v51, %s1816_s30  ;;  %s1455_s30 = sshll.u32 %s1796_s22, 3 }
 0x2ed   : > { %v1067_v53 = vpop.f32.mrb[26].mxu1 }
 0x2ee   : > { %v1069_v55 = vpop.f32.mrb[27].mxu1  ;;  %1184 = vrot.lane.b32.xlu0 %v1067_v53, %s1817_s10 }
 0x2ef   : > { %1186 = vrot.lane.b32.xlu1 %v1069_v55, %s1817_s10 }
 0x2f1   : > { %v1073_v57 = vpop.f32.mrb[28].mxu1 }
 0x2f2   : > { %v1075_v49 = vpop.f32.mrb[29].mxu1  ;;  %1188 = vrot.lane.b32.xlu0 %v1073_v57, %s1817_s10 }
 0x2f3   : > { %1190 = vrot.lane.b32.xlu1 %v1075_v49, %s1817_s10 }
 0x2f5   : > { %v1079_v50 = vpop.f32.mrb[30].mxu1 }
 0x2f6   : > { %v1081_v58 = vpop.f32.mrb[31].mxu1  ;;  %1202 = vrot.lane.b32.xlu0 %v1079_v50, %s1819_s5 }
 0x2f7   : > { %1204 = vrot.lane.b32.xlu1 %v1081_v58, %s1819_s5 }
 0x2f9   : > { %v1085_v59 = vpop.f32.mrb[32].mxu1 }
 0x2fa   : > { %v1087_v52 = vpop.f32.mrb[33].mxu1  ;;  %1206 = vrot.lane.b32.xlu0 %v1085_v59, %s1819_s5 }
 0x2fb   : > { %1208 = vrot.lane.b32.xlu1 %v1087_v52, %s1819_s5  ;;  %s1284_s5 = sadd.s32 %s1792_s21, %s1455_s30 }
 0x2fc   : > { %s1456_s11 = sshll.u32 %s1284_s5, 7 }
 0x2fd   : > { %v1091_v54 = vpop.f32.mrb[34].mxu1  ;;  %s2368_s8 = scalar_lea.hbm %s2437_s4, %s1456_s11 }
 0x2fe   : > { %v1093_v61 = vpop.f32.mrb[35].mxu1  ;;  %1220 = vrot.lane.b32.xlu0 %v1091_v54, %s1813_s27 }
 0x2ff   : > { %1222 = vrot.lane.b32.xlu1 %v1093_v61, %s1813_s27 }
 0x301   : > { %v1097_v35 = vpop.f32.mrb[36].mxu1 }
 0x302   : > { %v1099_v62 = vpop.f32.mrb[37].mxu1  ;;  %1224 = vrot.lane.b32.xlu0 %v1097_v35, %s1813_s27 }
 0x303   : > { %1226 = vrot.lane.b32.xlu1 %v1099_v62, %s1813_s27  ;;  %s240_s27 = sand.u32 1, %s1772_s16  }
 0x304   : > { %s1396_s10 = sshll.u32 %s240_s27, 4  ;;  %s2372_s18 = scalar_lea.sflag [#allocation4], %s240_s27 }
 0x305   : > { %v1103_v63 = vpop.f32.mrb[38].mxu1  ;;  %s242_s6 = scalar_lea.vmem [#allocation5], %s1396_s10 }
 0x306   : > { %v1105_v1 = vpop.f32.mrb[39].mxu1  ;;  %1238 = vrot.lane.b32.xlu0 %v1103_v63, %s2455_s26  ;;  %s1287_s22 = sshll.u32 %s242_s6, 4  ;;  %s2362_s22 = int_to_ptr.vmem [resolvable:$true] %s1287_s22 }
 0x307   : > { %1240 = vrot.lane.b32.xlu1 %v1105_v1, %s2455_s26  ;;  %s1686_s28 = scalar_lea.vmem %s2362_s22, 256 }
 0x308   : > { %p1687_p8 = scmp.ne.s32.totalorder %s2362_s22, %s1686_s28 }
 0x309   : > { %v1109_v2 = vpop.f32.mrb[40].mxu1 }
 0x30a   : > { %v1111_v56 = vpop.f32.mrb[41].mxu1  ;;  %1242 = vrot.lane.b32.xlu0 %v1109_v2, %s2455_s26  ;;  %p1688_p4 = pnand %p1687_p8, %p2457_p2 }
 0x30b   : > { %1244 = vrot.lane.b32.xlu1 %v1111_v56, %s2455_s26  ;;  %s1820_s26 = smov [#allocation5]  }
 0x30c   : > { %p1689_p11 = pneg %p1688_p4 }
 0x30d   : > { %v1115_v3 = vpop.f32.mrb[42].mxu1 }
 0x30e   : > { %v1117_v4 = vpop.f32.mrb[43].mxu1  ;;  %1256 = vrot.lane.b32.xlu0 %v1115_v3, %s2456_s9 }
 0x30f   : > { %1258 = vrot.lane.b32.xlu1 %v1117_v4, %s2456_s9 }
 0x311   : > { %v1121_v5 = vpop.f32.mrb[44].mxu1 }
 0x312   : > { %v1123_v6 = vpop.f32.mrb[45].mxu1  ;;  %1260 = vrot.lane.b32.xlu0 %v1121_v5, %s2456_s9 }
 0x313   : > { %1262 = vrot.lane.b32.xlu1 %v1123_v6, %s2456_s9  ;;  %s1690_s9 = sshll.u32 %s1820_s26, 4  ;;  %s1691_s9 = int_to_ptr.vmem [resolvable:$false] %s1690_s9 }
 0x314   : > { %s1692_s30 = scalar_lea.vmem %s1691_s9, 512  ;;  %p1693_p1 = scmp.lt.s32.totalorder %s2362_s22, %s1691_s9 }
 0x315   : > { %p1694_p7 = scmp.lt.s32.totalorder %s1692_s30, %s1686_s28 }
 0x317   : > { %p1695_p10 = por %p1694_p7, %p1693_p1 }
 0x319   : > { %p1696_p3 = pnand %p1695_p10, %p1689_p11 }
 0x348   : > { %v1131_v45 = vpop.permute.xlu0 %1130 }
 0x349   : > { %v1133_v7 = vpop.permute.xlu1 %1132 }
 0x34a   : > { %v1138_v24 = vsel %vm666_vm1, %v1131_v45, %v1133_v7 }
 0x34b   : > { %v1142_v27 = vadd.f32 %v1138_v24, %v2304_v30 }
 0x34c   : > { %v1135_v8 = vpop.permute.xlu0 %1134 }
 0x34d   : > { %v1137_v9 = vpop.permute.xlu1 %1136 }
 0x34e   : > { %v1139_v41 = vsel %vm666_vm1, %v1135_v8, %v1137_v9 }
 0x34f   : > { %v1143_v0 = vadd.f32 %v1139_v41, %v2306_v32 }
 0x350   : > { %v1149_v10 = vpop.permute.xlu0 %1148 }
 0x351   : > { %v1151_v43 = vpop.permute.xlu1 %1150 }
 0x352   : > { %v1156_v25 = vsel %vm689_vm2, %v1149_v10, %v1151_v43 }
 0x353   : > { %v1160_v33 = vadd.f32 %v1156_v25, %v1142_v27 }
 0x354   : > { %v1153_v11 = vpop.permute.xlu0 %1152 }
 0x355   : > { %v1155_v12 = vpop.permute.xlu1 %1154 }
 0x356   : > { %v1157_v34 = vsel %vm689_vm2, %v1153_v11, %v1155_v12 }
 0x357   : > { %v1161_v29 = vadd.f32 %v1157_v34, %v1143_v0 }
 0x358   : > { %v1167_v60 = vpop.permute.xlu0 %1166 }
 0x359   : > { %v1169_v39 = vpop.permute.xlu1 %1168 }
 0x35a   : > { %v1174_v31 = vsel %vm712_vm3, %v1167_v60, %v1169_v39 }
 0x35b   : > { %v1178_v40 = vadd.f32 %v1174_v31, %v1160_v33 }
 0x35c   : > { %v1171_v13 = vpop.permute.xlu0 %1170 }
 0x35d   : > { %v1173_v37 = vpop.permute.xlu1 %1172 }
 0x35e   : > { %v1175_v47 = vsel %vm712_vm3, %v1171_v13, %v1173_v37 }
 0x35f   : > { %v1179_v53 = vadd.f32 %v1175_v47, %v1161_v29 }
 0x360   : > { %v1185_v14 = vpop.permute.xlu0 %1184 }
 0x361   : > { %v1187_v15 = vpop.permute.xlu1 %1186 }
 0x362   : > { %v1192_v36 = vsel %vm735_vm5, %v1185_v14, %v1187_v15 }
 0x363   : > { %v1196_v42 = vadd.f32 %v1192_v36, %v1178_v40 }
 0x364   : > { %v1189_v16 = vpop.permute.xlu0 %1188 }
 0x365   : > { %v1191_v17 = vpop.permute.xlu1 %1190 }
 0x366   : > { %v1193_v46 = vsel %vm735_vm5, %v1189_v16, %v1191_v17 }
 0x367   : > { %v1197_v50 = vadd.f32 %v1193_v46, %v1179_v53 }
 0x368   : > { %v1203_v18 = vpop.permute.xlu0 %1202 }
 0x369   : > { %v1205_v19 = vpop.permute.xlu1 %1204 }
 0x36a   : > { %v1210_v30 = vsel %vm758_vm6, %v1203_v18, %v1205_v19 }
 0x36b   : > { %v1214_v55 = vadd.f32 %v1210_v30, %v1196_v42 }
 0x36c   : > { %v1207_v20 = vpop.permute.xlu0 %1206 }
 0x36d   : > { %v1209_v21 = vpop.permute.xlu1 %1208 }
 0x36e   : > { %v1211_v32 = vsel %vm758_vm6, %v1207_v20, %v1209_v21 }
 0x36f   : > { %v1215_v54 = vadd.f32 %v1211_v32, %v1197_v50 }
 0x370   : > { %v1221_v22 = vpop.permute.xlu0 %1220 }
 0x371   : > { %v1223_v23 = vpop.permute.xlu1 %1222 }
 0x372   : > { %v1228_v48 = vsel %vm787_vm4, %v1221_v22, %v1223_v23 }
 0x373   : > { %v1232_v58 = vadd.f32 %v1228_v48, %v1214_v55 }
 0x374   : > { %v1225_v26 = vpop.permute.xlu0 %1224 }
 0x375   : > { %v1227_v28 = vpop.permute.xlu1 %1226 }
 0x376   : > { %v1229_v59 = vsel %vm787_vm4, %v1225_v26, %v1227_v28 }
 0x377   : > { %v1233_v1 = vadd.f32 %v1229_v59, %v1215_v54 }
 0x378   : > { %v1239_v38 = vpop.permute.xlu0 %1238 }
 0x379   : > { %v1241_v44 = vpop.permute.xlu1 %1240 }
 0x37a   : > { %v1246_v49 = vsel %vm818_vm7, %v1239_v38, %v1241_v44 }
 0x37b   : > { %v1250_v61 = vadd.f32 %v1246_v49, %v1232_v58 }
 0x37c   : > { %v1243_v51 = vpop.permute.xlu0 %1242 }
 0x37d   : > { %v1245_v57 = vpop.permute.xlu1 %1244 }
 0x37e   : > { %v1247_v62 = vsel %vm818_vm7, %v1243_v51, %v1245_v57 }
 0x37f   : > { %v1251_v3 = vadd.f32 %v1247_v62, %v1233_v1 }
 0x380   : > { %v1257_v52 = vpop.permute.xlu0 %1256 }
 0x381   : > { %v1259_v35 = vpop.permute.xlu1 %1258 }
 0x382   : > { %v1264_v63 = vsel %vm849_vm8, %v1257_v52, %v1259_v35 }
 0x383   : > { %v1268_v2 = vadd.f32 %v1264_v63, %v1250_v61 }
 0x384   : > { %v1261_v56 = vpop.permute.xlu0 %1260 }
 0x385   : > { %1270 = vst [vmem:[%s242_s6] sm:$0xff] %v1268_v2  ;;  %v1263_v4 = vpop.permute.xlu1 %1262 }
 0x386   : > { %v1265_v5 = vsel %vm849_vm8, %v1261_v56, %v1263_v4 }
 0x387   : > { %v1269_v6 = vadd.f32 %v1265_v5, %v1251_v3 }
 0x389   : > { %1271 = vst [vmem:[%s242_s6 + $0x8] sm:$0xff] %v1269_v6 }
 0x38a   : > { %1699 = shalt.err (!%p1696_p3)
}
 0x38b   : > { %s1700_s27 = scalar_lea.hbm %s2368_s8, 256  ;;  %s1704_s6 = scalar_lea.hbm %s2437_s4, 2048 }
 0x38c   : > { %p1701_p12 = scmp.ne.s32.totalorder %s2368_s8, %s1700_s27  ;;  %p1705_p6 = scmp.lt.u32.totalorder %s2368_s8, %s2437_s4 }
 0x38d   : > { %p1706_p9 = scmp.lt.u32.totalorder %s1704_s6, %s1700_s27  ;;  %p1708_p8 = scmp.lt.u32.totalorder %s1700_s27, %s2368_s8 }
 0x38e   : > { %p1702_p0 = pnand %p1701_p12, %p2457_p2 }
 0x38f   : > { %p1707_p13 = por %p1706_p9, %p1705_p6 }
 0x390   : > { %p1703_p5 = pneg %p1702_p0 }
 0x391   : > { %p1709_p4 = por %p1708_p8, %p1707_p13 }
 0x393   : > { %p1710_p11 = pnand %p1709_p4, %p1703_p5 }
 0x395   : > { %1713 = shalt.err (!%p1710_p11)
}
 0x396   : > { %s1821_s29 = smov 128   ;;  %s1822_s28 = smov 512  }
 0x397   : > { %s1823_s26 = smov 8  }
 0x398   : > { %1544 = dma.vmem_to_hbm [thread:$0]  (%p2457_p2), %s2362_s22, 256, %s2368_s8, %s2372_s18, %s1821_s29, %s1822_s28, %s1823_s26  }
 0x399 PF: > { %p1555_p1 = scmp.ge.s32.totalorder %s1808_s25, 2  ;;  %s1302_s9 = sand.u32 1, %s1768_s15  }
 0x39a   : > { %p2458_p7 = scmp.ne.s32.totalorder %s2450_s14, 0  ;;  %s1303_s30 = scalar_lea.sflag [#allocation4], %s1302_s9 }
 0x39c   : > { %p1551_p10 = pnand %p1555_p1, %p2458_p7 }
 0x39e   : > { %1763 = dma.done.wait (!%p1551_p10), %s1303_s30, 256  }
 0x39f   : > { %1765 = vsyncadd (!%p1551_p10), %s1303_s30, 4294967040  ;;  %s20_s25 = sadd.s32 1, %s1808_s25   ;;  %s2459_s13 = sld [smem:[#allocation8_spill]] }
 0x3a0   : > { %p17_p3 = scmp.ge.s32.totalorder %s20_s25, 10   ;;  %s2460_s8 = sld [smem:[#allocation9_spill]] }
 0x3a1   : > { %s2461_s15 = smov %s1772_s16  ;;  %s2462_s16 = smov %s1776_s17 }
 0x3a2   : > { %s2463_s17 = smov %s1937_s12  ;;  %s2464_s18 = smov %s1784_s19 }
 0x3a3   : > { %s2465_s19 = smov %s1788_s20  ;;  %s2466_s20 = smov %s1923_s7 }
 0x3a4   : > { %s2467_s21 = smov %s1800_s23  ;;  %s2468_s22 = smov %s1804_s24 }
 0x3a5   : > { %s2469_s23 = smov %s2459_s13  ;;  %19 = sbr.rel (!%p17_p3) target bundleno = 9 (0x9), region = 85 }
 0x3a6   : > { %s2470_s24 = smov %s2460_s8 }
 0x3ac   :  { %1308 = vsyncpa [#allocation3], 1 }
 0x3ad   :  { %1310 = vsyncpa [#allocation3 + $0x1], 1 }
 0x3ae   :  { %1311 = vsyncpa [#allocation4], 1 }
 0x3af   :  { %1313 = vsyncpa [#allocation4 + $0x1], 1 }

</bundles_post_ra>
